<compile_context>
chip_gen: v6e
topology: v6e:2x2x1
jax: 0.10.0
libtpu: 0.0.40
codegen_flags: <defaults>
</compile_context>

<pallas_src>
import math

import jax
import jax.numpy as jnp
from jax.experimental import pallas as pl
from jax.experimental.pallas import tpu as pltpu

LANE = 128
SUBLANE = 8


def _cdiv(a, b):
    return -(-a // b)


def _vmem_usable_bytes():
    # Generation-aware cap: v7x has 64 MiB/TC, v5e/v6e have 128 MiB.
    try:
        cap = int(pltpu.get_tpu_info().vmem_capacity_bytes)
    except Exception:
        cap = 64 << 20  # conservative fallback that fits every generation
    return int(0.85 * cap)


def _pick_tiling(rows, tile_rows_max):
    """Return (num_tiles, tile_rows, rows_pad), avoiding row padding when possible."""
    tile_rows_max = max(SUBLANE, int(tile_rows_max))
    if rows <= tile_rows_max:
        # Single block equal to the full (rows, LANE) array: exempt from the
        # (8,128) divisibility rule -> no row padding at all.
        return 1, rows, rows
    hi = tile_rows_max - (tile_rows_max % SUBLANE)
    # Prefer an exact divisor of `rows` (no padding) while keeping tiles large
    # enough (>= hi/2 rows) for good HBM pipelining (matters most on v5e).
    lo = max(SUBLANE, hi // 2)
    for t in range(hi, lo - 1, -SUBLANE):
        if rows % t == 0:
            return rows // t, t, rows
    num_tiles = _cdiv(rows, hi)
    tile_rows = _cdiv(_cdiv(rows, num_tiles), SUBLANE) * SUBLANE
    num_tiles = _cdiv(rows, tile_rows)
    return num_tiles, tile_rows, num_tiles * tile_rows


def add_norm(x, y, *, eps=1e-5, tile_rows_max=1024, force_streaming=False):
    """LayerNorm(dropout(x + y)) over all non-batch dims; x, y: (B, ...)."""
    assert x.shape == y.shape, (x.shape, y.shape)
    assert x.ndim >= 2
    B = x.shape[0]
    n = math.prod(x.shape[1:])                 # true number of normalized elements

    rows = _cdiv(n, LANE)
    num_tiles, tile_rows, rows_pad = _pick_tiling(rows, tile_rows_max)
    n_pad = rows_pad * LANE

    xf = x.reshape(B, n)
    yf = y.reshape(B, n)
    if n_pad != n:                             # only when n % 128 != 0 or ragged tiling
        xf = jnp.pad(xf, ((0, 0), (0, n_pad - n)))
        yf = jnp.pad(yf, ((0, 0), (0, n_pad - n)))
    xr = xf.reshape(B, rows_pad, LANE)
    yr = yf.reshape(B, rows_pad, LANE)

    itemsize = jnp.dtype(x.dtype).itemsize
    tile_bytes = tile_rows * LANE * itemsize
    slab_bytes = rows_pad * LANE * itemsize
    cap = _vmem_usable_bytes()
    # Slab path: 2 inputs x 2 buffers x tile, output slab double-buffered across batches.
    est_slab = 2 * 2 * tile_bytes + 2 * slab_bytes + (2 << 20)
    use_streaming = force_streaming or (est_slab > cap)

    small_unroll = num_tiles <= 8

    # ------------------------------------------------------------------ slab path
    def kernel_slab(x_ref, y_ref, o_ref, s1_ref):
        t = pl.program_id(1)

        @pl.when(t == 0)
        def _init():
            s1_ref[...] = jnp.zeros_like(s1_ref)

        # Fused add; z parked directly in the resident output block (the output
        # block doubles as the z accumulator -> no separate f32 slab scratch).
        z = x_ref[...].astype(jnp.float32) + y_ref[...].astype(jnp.float32)
        row0 = pl.multiple_of(t * tile_rows, tile_rows)
        o_ref[pl.ds(row0, tile_rows), :] = z.astype(o_ref.dtype)
        s1_ref[...] += jnp.sum(z, axis=0, keepdims=True)     # per-lane partial sums

        @pl.when(t == pl.num_programs(1) - 1)
        def _finalize():
            n_f = jnp.float32(n)
            mean = jnp.sum(s1_ref[...], axis=1, keepdims=True) / n_f          # (1,1)

            # Two-pass biased variance over the VMEM-resident slab, chunked so no
            # slab-sized f32 temporary is materialized (VMEM-only traffic).
            def var_body(i, acc):
                r0 = pl.multiple_of(i * tile_rows, tile_rows)
                zc = o_ref[pl.ds(r0, tile_rows), :].astype(jnp.float32) - mean
                return acc + jnp.sum(zc * zc, axis=0, keepdims=True)

            ssq_lane = jax.lax.fori_loop(
                0, num_tiles, var_body, jnp.zeros((1, LANE), jnp.float32),
                unroll=small_unroll)
            ssq = jnp.sum(ssq_lane, axis=1, keepdims=True)                     # (1,1)
            # Zero-padded elements each contributed (0 - mean)^2; remove exactly.
            ssq = ssq - jnp.float32(n_pad - n) * mean * mean
            var = jnp.maximum(ssq / n_f, 0.0)
            inv = jax.lax.rsqrt(var + jnp.float32(eps))

            def norm_body(i, carry):
                r0 = pl.multiple_of(i * tile_rows, tile_rows)
                zc = o_ref[pl.ds(r0, tile_rows), :].astype(jnp.float32)
                o_ref[pl.ds(r0, tile_rows), :] = ((zc - mean) * inv).astype(o_ref.dtype)
                return carry

            jax.lax.fori_loop(0, num_tiles, norm_body, 0, unroll=small_unroll)

    # ------------------------------------------------------------- streaming path
    def kernel_stream(x_ref, y_ref, o_ref, s1_ref, s2_ref, mean_ref, inv_ref):
        p = pl.program_id(1)
        t = pl.program_id(2)

        @pl.when((p == 0) & (t == 0))
        def _init():
            s1_ref[...] = jnp.zeros_like(s1_ref)
            s2_ref[...] = jnp.zeros_like(s2_ref)

        @pl.when(p == 0)
        def _accumulate():
            z = x_ref[...].astype(jnp.float32) + y_ref[...].astype(jnp.float32)
            s1_ref[...] += jnp.sum(z, axis=0, keepdims=True)
            s2_ref[...] += jnp.sum(z * z, axis=0, keepdims=True)

            @pl.when(t == pl.num_programs(2) - 1)
            def _stats():
                n_f = jnp.float32(n)
                s1 = jnp.sum(s1_ref[...], axis=1, keepdims=True)               # (1,1)
                s2 = jnp.sum(s2_ref[...], axis=1, keepdims=True)
                mean = s1 / n_f
                # Single-pass variance here (two-pass would need a third sweep and
                # ~7N HBM traffic); padded zeros contribute 0 to both sums.
                var = jnp.maximum(s2 / n_f - mean * mean, 0.0)
                inv = jax.lax.rsqrt(var + jnp.float32(eps))
                mean_ref[...] = jnp.broadcast_to(mean, (1, LANE))
                inv_ref[...] = jnp.broadcast_to(inv, (1, LANE))

        @pl.when(p == 1)
        def _normalize():
            z = x_ref[...].astype(jnp.float32) + y_ref[...].astype(jnp.float32)
            o_ref[...] = ((z - mean_ref[...]) * inv_ref[...]).astype(o_ref.dtype)

    # ------------------------------------------------------------------ dispatch
    if not use_streaming:
        vmem_limit = min(cap, max(32 << 20, int(1.25 * est_slab)))
        grid_spec = pltpu.PrefetchScalarGridSpec(
            num_scalar_prefetch=0,
            grid=(B, num_tiles),
            in_specs=[
                pl.BlockSpec((None, tile_rows, LANE), lambda b, t: (b, t, 0)),
                pl.BlockSpec((None, tile_rows, LANE), lambda b, t: (b, t, 0)),
            ],
            out_specs=pl.BlockSpec((None, rows_pad, LANE), lambda b, t: (b, 0, 0)),
            scratch_shapes=[pltpu.VMEM((1, LANE), jnp.float32)],   # per-lane sum(z)
        )
        kernel = kernel_slab
        dim_sem = ("parallel", "arbitrary")
    else:
        est_stream = 2 * 2 * tile_bytes + 2 * tile_bytes + (2 << 20)
        vmem_limit = min(cap, max(32 << 20, int(1.25 * est_stream)))
        grid_spec = pltpu.PrefetchScalarGridSpec(
            num_scalar_prefetch=0,
            grid=(B, 2, num_tiles),
            in_specs=[
                pl.BlockSpec((None, tile_rows, LANE), lambda b, p, t: (b, t, 0)),
                pl.BlockSpec((None, tile_rows, LANE), lambda b, p, t: (b, t, 0)),
            ],
            # Phase 0 parks on output tile 0 (never written, never flushed until
            # phase 1 writes it); phase 1 streams tile-sized normalized outputs.
            out_specs=pl.BlockSpec((None, tile_rows, LANE),
                                   lambda b, p, t: (b, p * t, 0)),
            scratch_shapes=[
                pltpu.VMEM((1, LANE), jnp.float32),   # per-lane sum(z)
                pltpu.VMEM((1, LANE), jnp.float32),   # per-lane sum(z*z)
                pltpu.VMEM((1, LANE), jnp.float32),   # mean (broadcast)
                pltpu.VMEM((1, LANE), jnp.float32),   # rsqrt(var+eps) (broadcast)
            ],
        )
        kernel = kernel_stream
        dim_sem = ("parallel", "arbitrary", "arbitrary")

    out = pl.pallas_call(
        kernel,
        out_shape=jax.ShapeDtypeStruct((B, rows_pad, LANE), x.dtype),
        grid_spec=grid_spec,
        compiler_params=pltpu.CompilerParams(
            dimension_semantics=dim_sem,
            vmem_limit_bytes=vmem_limit,
        ),
    )(xr, yr)

    if n_pad == n:
        return out.reshape(x.shape)
    return out.reshape(B, n_pad)[:, :n].reshape(x.shape)


def add_norm_ref(x, y, eps=1e-5):
    # Pure-JAX reference (two-pass LayerNorm over all non-batch dims).
    z = (x + y).astype(jnp.float32)
    axes = tuple(range(1, z.ndim))
    mean = jnp.mean(z, axis=axes, keepdims=True)
    var = jnp.mean((z - mean) ** 2, axis=axes, keepdims=True)
    return ((z - mean) * jax.lax.rsqrt(var + eps)).astype(x.dtype)


if __name__ == "__main__":
    key = jax.random.PRNGKey(0)
    k1, k2, k3, k4, k5, k6 = jax.random.split(key, 6)

    # Test 1: module-consistent small shape (B, S, H).  n = 256 is a multiple of
    # 128 and fits one block -> zero wrapper padding, single-tile slab path.
    B, S, H = 2, 8, 32
    x1 = jax.random.normal(k1, (B, S, H), dtype=jnp.float32)
    y1 = jax.random.normal(k2, (B, S, H), dtype=jnp.float32)
    out1 = add_norm(x1, y1)
    jax.block_until_ready(out1)
    ref1 = add_norm_ref(x1, y1)
    assert out1.shape == (B, S, H)
    assert jnp.allclose(out1, ref1, atol=1e-4, rtol=1e-4), float(jnp.max(jnp.abs(out1 - ref1)))

    # Test 2: multi-tile slab path (small tile_rows_max forces 3 tiles, no padding).
    x2 = jax.random.normal(k3, (2, 32, 96), dtype=jnp.float32)
    y2 = jax.random.normal(k4, (2, 32, 96), dtype=jnp.float32)
    out2 = add_norm(x2, y2, tile_rows_max=8)
    jax.block_until_ready(out2)
    ref2 = add_norm_ref(x2, y2)
    assert jnp.allclose(out2, ref2, atol=1e-4, rtol=1e-4), float(jnp.max(jnp.abs(out2 - ref2)))

    # Test 3: streaming (two-phase, O(tile) VMEM) fallback path.
    out3 = add_norm(x2, y2, tile_rows_max=8, force_streaming=True)
    jax.block_until_ready(out3)
    assert jnp.allclose(out3, ref2, atol=1e-4, rtol=1e-4), float(jnp.max(jnp.abs(out3 - ref2)))

    # Test 4: lane-padding path (n = 185, not a multiple of 128) -> exercises the
    # padded-zero correction in the two-pass variance and the output slice.
    x4 = jax.random.normal(k5, (2, 5, 37), dtype=jnp.float32)
    y4 = jax.random.normal(k6, (2, 5, 37), dtype=jnp.float32)
    out4 = add_norm(x4, y4)
    jax.block_until_ready(out4)
    ref4 = add_norm_ref(x4, y4)
    assert jnp.allclose(out4, ref4, atol=1e-4, rtol=1e-4), float(jnp.max(jnp.abs(out4 - ref4)))

    print("KERNEL_OK")
</pallas_src>

<mosaic_0001>
module attributes {stable_mosaic.version = 11 : i64} {
  func.func @kernel_slab(%arg0: i32, %arg1: i32, %arg2: memref<1x2x128xf32, #tpu.memory_space<vmem>>, %arg3: memref<1x2x128xf32, #tpu.memory_space<vmem>>, %arg4: memref<1x2x128xf32, #tpu.memory_space<vmem>>, %arg5: memref<1x128xf32, #tpu.memory_space<vmem>>) attributes {dimension_semantics = [#tpu.dimension_semantics<parallel>, #tpu.dimension_semantics<arbitrary>], iteration_bounds = array<i64: 2, 1>, scalar_prefetch = 0 : i64, scratch_operands = 1 : i64, tpu.core_type = #tpu.core_type<tc>, window_params = [{transform_indices = @transform_0, window_bounds = array<i64: 1, 2, 128>}, {transform_indices = @transform_1, window_bounds = array<i64: 1, 2, 128>}, {transform_indices = @transform_2, window_bounds = array<i64: 1, 2, 128>}]} {
    %c0_i32 = arith.constant 0 : i32
    %0 = arith.cmpi eq, %arg1, %c0_i32 : i32
    %1 = arith.extui %0 : i1 to i32
    %c0_i32_0 = arith.constant 0 : i32
    %2 = arith.cmpi ne, %1, %c0_i32_0 : i32
    scf.if %2 {
      %cst_14 = arith.constant 0.000000e+00 : f32
      %22 = vector.broadcast %cst_14 : f32 to vector<1x128xf32>
      %c0_15 = arith.constant 0 : index
      %c0_16 = arith.constant 0 : index
      %23 = vector.load %arg5[%c0_15, %c0_16] : memref<1x128xf32, #tpu.memory_space<vmem>>, vector<1x128xf32>
      tpu.vector_store %arg5[%c0_15, %c0_16], %22 {strides = array<i32>} : memref<1x128xf32, #tpu.memory_space<vmem>>, vector<1x128xf32>,
    } else {
    }
    %c0 = arith.constant 0 : index
    %c0_1 = arith.constant 0 : index
    %c0_2 = arith.constant 0 : index
    %3 = vector.load %arg2[%c0, %c0_1, %c0_2] : memref<1x2x128xf32, #tpu.memory_space<vmem>>, vector<1x2x128xf32>
    %4 = vector.shape_cast %3 : vector<1x2x128xf32> to vector<2x128xf32>
    %c0_3 = arith.constant 0 : index
    %c0_4 = arith.constant 0 : index
    %c0_5 = arith.constant 0 : index
    %5 = vector.load %arg3[%c0_3, %c0_4, %c0_5] : memref<1x2x128xf32, #tpu.memory_space<vmem>>, vector<1x2x128xf32>
    %6 = vector.shape_cast %5 : vector<1x2x128xf32> to vector<2x128xf32>
    %7 = arith.addf %4, %6 : vector<2x128xf32>
    %c2_i32 = arith.constant 2 : i32
    %8 = arith.muli %arg1, %c2_i32 : i32
    %9 = tpu.assume_multiple %8, 2 : i32
    %c0_6 = arith.constant 0 : index
    %10 = arith.index_cast %9 : i32 to index
    %c0_7 = arith.constant 0 : index
    %11 = vector.load %arg4[%c0_6, %10, %c0_7] : memref<1x2x128xf32, #tpu.memory_space<vmem>>, vector<1x2x128xf32>
    %12 = vector.shape_cast %11 : vector<1x2x128xf32> to vector<2x128xf32>
    %13 = vector.shape_cast %7 : vector<2x128xf32> to vector<1x2x128xf32>
    tpu.vector_store %arg4[%c0_6, %10, %c0_7], %13 {strides = array<i32>} : memref<1x2x128xf32, #tpu.memory_space<vmem>>, vector<1x2x128xf32>,
    %c0_8 = arith.constant 0 : index
    %c0_9 = arith.constant 0 : index
    %14 = vector.load %arg5[%c0_8, %c0_9] : memref<1x128xf32, #tpu.memory_space<vmem>>, vector<1x128xf32>
    %cst = arith.constant dense<0.000000e+00> : vector<128xf32>
    %15 = vector.multi_reduction <add>, %7, %cst [0] : vector<2x128xf32> to vector<128xf32>
    %16 = vector.shape_cast %15 : vector<128xf32> to vector<1x128xf32>
    %17 = arith.addf %14, %16 : vector<1x128xf32>
    %c0_10 = arith.constant 0 : index
    %c0_11 = arith.constant 0 : index
    %18 = vector.load %arg5[%c0_10, %c0_11] : memref<1x128xf32, #tpu.memory_space<vmem>>, vector<1x128xf32>
    tpu.vector_store %arg5[%c0_10, %c0_11], %17 {strides = array<i32>} : memref<1x128xf32, #tpu.memory_space<vmem>>, vector<1x128xf32>,
    %c0_i32_12 = arith.constant 0 : i32
    %19 = arith.cmpi eq, %arg1, %c0_i32_12 : i32
    %20 = arith.extui %19 : i1 to i32
    %c0_i32_13 = arith.constant 0 : i32
    %21 = arith.cmpi ne, %20, %c0_i32_13 : i32
    scf.if %21 {
      %c0_14 = arith.constant 0 : index
      %c0_15 = arith.constant 0 : index
      %22 = vector.load %arg5[%c0_14, %c0_15] : memref<1x128xf32, #tpu.memory_space<vmem>>, vector<1x128xf32>
      %cst_16 = arith.constant dense<0.000000e+00> : vector<1xf32>
      %23 = vector.multi_reduction <add>, %22, %cst_16 [1] : vector<1x128xf32> to vector<1xf32>
      %24 = vector.shape_cast %23 : vector<1xf32> to vector<1x1xf32>
      %cst_17 = arith.constant 2.560000e+02 : f32
      %25 = vector.broadcast %cst_17 : f32 to vector<1x1xf32>
      %26 = arith.divf %24, %25 : vector<1x1xf32>
      %cst_18 = arith.constant 0.000000e+00 : f32
      %27 = vector.broadcast %cst_18 : f32 to vector<1x128xf32>
      %c0_i32_19 = arith.constant 0 : i32
      %c2_i32_20 = arith.constant 2 : i32
      %28 = arith.muli %c0_i32_19, %c2_i32_20 : i32
      %29 = tpu.assume_multiple %28, 2 : i32
      %c0_21 = arith.constant 0 : index
      %30 = arith.index_cast %29 : i32 to index
      %c0_22 = arith.constant 0 : index
      %31 = vector.load %arg4[%c0_21, %30, %c0_22] : memref<1x2x128xf32, #tpu.memory_space<vmem>>, vector<1x2x128xf32>
      %32 = vector.shape_cast %31 : vector<1x2x128xf32> to vector<2x128xf32>
      %33 = vector.broadcast %26 : vector<1x1xf32> to vector<2x128xf32>
      %34 = arith.subf %32, %33 : vector<2x128xf32>
      %35 = arith.mulf %34, %34 : vector<2x128xf32>
      %cst_23 = arith.constant dense<0.000000e+00> : vector<128xf32>
      %36 = vector.multi_reduction <add>, %35, %cst_23 [0] : vector<2x128xf32> to vector<128xf32>
      %37 = vector.shape_cast %36 : vector<128xf32> to vector<1x128xf32>
      %38 = arith.addf %27, %37 : vector<1x128xf32>
      %c1_i32 = arith.constant 1 : i32
      %cst_24 = arith.constant dense<0.000000e+00> : vector<1xf32>
      %39 = vector.multi_reduction <add>, %38, %cst_24 [1] : vector<1x128xf32> to vector<1xf32>
      %40 = vector.shape_cast %39 : vector<1xf32> to vector<1x1xf32>
      %cst_25 = arith.constant 0.000000e+00 : f32
      %41 = vector.broadcast %cst_25 : f32 to vector<1x1xf32>
      %42 = arith.mulf %41, %26 : vector<1x1xf32>
      %43 = arith.mulf %42, %26 : vector<1x1xf32>
      %44 = arith.subf %40, %43 : vector<1x1xf32>
      %cst_26 = arith.constant 2.560000e+02 : f32
      %45 = vector.broadcast %cst_26 : f32 to vector<1x1xf32>
      %46 = arith.divf %44, %45 : vector<1x1xf32>
      %cst_27 = arith.constant 0.000000e+00 : f32
      %47 = vector.broadcast %cst_27 : f32 to vector<1x1xf32>
      %48 = arith.maximumf %46, %47 : vector<1x1xf32>
      %cst_28 = arith.constant 9.99999974E-6 : f32
      %49 = vector.broadcast %cst_28 : f32 to vector<1x1xf32>
      %50 = arith.addf %48, %49 : vector<1x1xf32>
      %51 = math.rsqrt %50 : vector<1x1xf32>
      %c0_i32_29 = arith.constant 0 : i32
      %c2_i32_30 = arith.constant 2 : i32
      %52 = arith.muli %c0_i32_29, %c2_i32_30 : i32
      %53 = tpu.assume_multiple %52, 2 : i32
      %c0_31 = arith.constant 0 : index
      %54 = arith.index_cast %53 : i32 to index
      %c0_32 = arith.constant 0 : index
      %55 = vector.load %arg4[%c0_31, %54, %c0_32] : memref<1x2x128xf32, #tpu.memory_space<vmem>>, vector<1x2x128xf32>
      %56 = vector.shape_cast %55 : vector<1x2x128xf32> to vector<2x128xf32>
      %57 = vector.broadcast %26 : vector<1x1xf32> to vector<2x128xf32>
      %58 = arith.subf %56, %57 : vector<2x128xf32>
      %59 = vector.broadcast %51 : vector<1x1xf32> to vector<2x128xf32>
      %60 = arith.mulf %58, %59 : vector<2x128xf32>
      %c0_33 = arith.constant 0 : index
      %61 = arith.index_cast %53 : i32 to index
      %c0_34 = arith.constant 0 : index
      %62 = vector.load %arg4[%c0_33, %61, %c0_34] : memref<1x2x128xf32, #tpu.memory_space<vmem>>, vector<1x2x128xf32>
      %63 = vector.shape_cast %62 : vector<1x2x128xf32> to vector<2x128xf32>
      %64 = vector.shape_cast %60 : vector<2x128xf32> to vector<1x2x128xf32>
      tpu.vector_store %arg4[%c0_33, %61, %c0_34], %64 {strides = array<i32>} : memref<1x2x128xf32, #tpu.memory_space<vmem>>, vector<1x2x128xf32>,
      %c1_i32_35 = arith.constant 1 : i32
    } else {
    }
    return
  }
  func.func @transform_0(%arg0: i32, %arg1: i32) -> (i32, i32, i32) {
    %c0_i32 = arith.constant 0 : i32
    %c0_i32_0 = arith.constant 0 : i32
    return %arg0, %arg1, %c0_i32 : i32, i32, i32
  }
  func.func @transform_1(%arg0: i32, %arg1: i32) -> (i32, i32, i32) {
    %c0_i32 = arith.constant 0 : i32
    %c0_i32_0 = arith.constant 0 : i32
    return %arg0, %arg1, %c0_i32 : i32, i32, i32
  }
  func.func @transform_2(%arg0: i32, %arg1: i32) -> (i32, i32, i32) {
    %c0_i32 = arith.constant 0 : i32
    %c0_i32_0 = arith.constant 0 : i32
    %c0_i32_1 = arith.constant 0 : i32
    return %arg0, %c0_i32, %c0_i32_0 : i32, i32, i32
  }
}

</mosaic_0001>

<bundles_post_ra>
// kernel: tpu_custom_call.1
= control target key start
LH: loop header
LB: loop body
LE: loop exit
PB: predicated region body
PF: predicated region fallthrough
CT: control target
= control target key end

     0   :  { %7 = vsyncpa [#allocation4], 0  ;;  %s811_s0 = inlined_call_operand.hbm [shape: f32[2,2,128], index: 0, kind: input, shape index: {}]   ;;  %s812_s1 = inlined_call_operand.hbm [shape: f32[2,2,128], index: 1, kind: input, shape index: {}]   ;;  %s813_s2 = inlined_call_operand.hbm [shape: f32[2,2,128], index: 2, kind: output, shape index: {}]  }
   0x1   :  { %9 = vsyncpa [#allocation4 + $0x1], 0 }
   0x2   :  { %10 = vsyncpa [#allocation7], 0 }
   0x3   :  { %12 = vsyncpa [#allocation7 + $0x1], 0 }
   0x4   :  { %13 = vsyncpa [#allocation5], 0 }
   0x5   :  { %15 = vsyncpa [#allocation5 + $0x1], 0  ;;  %s642_s9 = smov 0   ;;  %s644_s10 = smov 0  }
   0x6   :  { %s646_s11 = smov 0   ;;  %s648_s12 = smov 0  }
   0x7   :  { %s650_s13 = smov 0   ;;  %s652_s14 = smov 0  }
   0x8 LB: > { %s395_s15 = sadd.s32 4294967295, %s621_s14   ;;  %s396_s16 = sadd.s32 4294967294, %s621_s14   ;;  %s621_s14 = sphi %s652_s14, %s21_s14   ;;  %s617_s13 = sphi %s650_s13, %s825_s13   ;;  %s613_s12 = sphi %s648_s12, %s824_s12   ;;  %s609_s11 = sphi %s646_s11, %s823_s11   ;;  %s605_s10 = sphi %s644_s10, %s822_s10   ;;  %s601_s9 = sphi %s642_s9, %s821_s9  }
   0x9   : > { %s33_s17 = sadd.s32 1, %s617_s13  ;;  %s42_s18 = sadd.s32 1, %s609_s11 }
   0xa   : > { %p35_p0 = scmp.ge.s32.totalorder %s33_s17, 2  ;;  %p49_p1 = scmp.ne.s32.totalorder %s609_s11, %s605_s10 }
   0xb   : > { %p50_p2 = scmp.eq.s32.totalorder %s621_s14, 0  ;;  %p55_p3 = scmp.ne.s32.totalorder %s605_s10, %s601_s9 }
   0xc   : > { %s827_s17 = smov (%p35_p0, %s33_s17), 0  ;;  %p56_p5 = scmp.eq.s32.totalorder %s395_s15, 0 }
   0xd   : > { %p683_p4 = por %p50_p2, %p49_p1  ;;  %s37_s20 = ssub.s32 %s617_s13, %s827_s17 }
   0xe   : > { %p107_p6 = scmp.eq.s32.totalorder %s395_s15, 1  ;;  %p40_p7 = scmp.eq.s32.totalorder %s37_s20, 0 }
   0xf   : > { %p689_p8 = por %p56_p5, %p55_p3  ;;  %p113_p10 = scmp.eq.s32.totalorder %s396_s16, 1 }
  0x10   : > { %p693_p9 = por %p107_p6, %p49_p1  ;;  %p428_p13 = scmp.lt.s32.totalorder %s621_s14, 2 }
  0x11   : > { %s698_s23 = scalar_select %p40_p7, %s609_s11, %s42_s18  }
  0x12   : > { %p700_p11 = por %p113_p10, %p55_p3  ;;  %s707_s25 = sand.u32 1, %s609_s11  }
  0x13   : > { %s399_s26 = sshll.u32 %s707_s25, 1  ;;  %s400_s27 = sshll.u32 %s617_s13, 5 }
  0x14   : > { %s143_s30 = scalar_lea.hbm %s811_s0, %s400_s27  ;;  %s137_s3 = scalar_lea.vmem [#allocation3], %s399_s26 }
  0x15   : > { %s145_s4 = sshll.u32 %s137_s3, 4  ;;  %p716_p0 = pnand %p428_p13, %p683_p4  ;;  %s146_s4 = int_to_ptr.vmem [resolvable:$true] %s145_s4 }
  0x16   : > { %p403_p1 = scmp.ge.s32.totalorder %s621_s14, 1  ;;  %p169_p2 = scmp.lt.s32.totalorder %s621_s14, 3 }
  0x17   : > { %s134_s6 = scalar_lea.sflag [#allocation4], %s707_s25  ;;  %p483_p3 = pneg %p716_p0 }
  0x18   : > { %s494_s7 = scalar_lea.vmem %s146_s4, 32  ;;  %s623_s8 = smov [#allocation3]  }
  0x19   : > { %p495_p5 = scmp.ne.s32.totalorder %s146_s4, %s494_s7  ;;  %s499_s15 = sshll.u32 %s623_s8, 4  ;;  %s500_s15 = int_to_ptr.vmem [resolvable:$false] %s499_s15 }
  0x1a   : > { %s501_s16 = scalar_lea.vmem %s500_s15, 64  ;;  %p502_p4 = scmp.lt.s32.totalorder %s146_s4, %s500_s15 }
  0x1b   : > { %p497_p6 = pnand %p495_p5, %p483_p3  ;;  %p503_p10 = scmp.lt.s32.totalorder %s501_s16, %s494_s7 }
  0x1d   : > { %p498_p7 = pneg %p497_p6  ;;  %p504_p13 = por %p503_p10, %p502_p4 }
  0x1f   : > { %p505_p12 = pnand %p504_p13, %p498_p7 }
  0x21   : > { %508 = shalt.err (!%p505_p12)
}
  0x22   : > { %420 = dma.hbm_to_vmem [thread:$0]  (!%p716_p0), %s143_s30, 32, %s146_s4, %s134_s6  }
  0x23   : > { %p734_p5 = pnand %p403_p1, %p169_p2  ;;  %s162_s28 = scalar_lea.hbm %s812_s1, %s400_s27 }
  0x24   : > { %s156_s29 = scalar_lea.vmem [#allocation6], %s399_s26  ;;  %s153_s7 = scalar_lea.sflag [#allocation7], %s707_s25 }
  0x25   : > { %s164_s3 = sshll.u32 %s156_s29, 4  ;;  %s624_s30 = smov [#allocation6]   ;;  %s165_s3 = int_to_ptr.vmem [resolvable:$true] %s164_s3 }
  0x26   : > { %s522_s8 = scalar_lea.vmem %s165_s3, 32  ;;  %s527_s4 = sshll.u32 %s624_s30, 4  ;;  %s528_s4 = int_to_ptr.vmem [resolvable:$false] %s527_s4 }
  0x27   : > { %p523_p12 = scmp.ne.s32.totalorder %s165_s3, %s522_s8  ;;  %s529_s6 = scalar_lea.vmem %s528_s4, 64 }
  0x28   : > { %p530_p1 = scmp.lt.s32.totalorder %s165_s3, %s528_s4  ;;  %p531_p2 = scmp.lt.s32.totalorder %s529_s6, %s522_s8 }
  0x29   : > { %p525_p6 = pnand %p523_p12, %p483_p3 }
  0x2a   : > { %p532_p4 = por %p531_p2, %p530_p1 }
  0x2b   : > { %p526_p7 = pneg %p525_p6 }
  0x2d   : > { %p533_p10 = pnand %p532_p4, %p526_p7 }
  0x2f   : > { %536 = shalt.err (!%p533_p10)
}
  0x30   : > { %423 = dma.hbm_to_vmem [thread:$0]  (!%p716_p0), %s162_s28, 32, %s165_s3, %s153_s7  }
  0x31   : > { %173 = sbr.rel (%p734_p5) target bundleno = 420 (0x1a4), region = 28  ;;  %s750_s25 = sand.u32 (!%p734_p5), 1, %s605_s10  }
  0x32   : > { %s404_s26 = sshll.u32 (!%p734_p5), %s750_s25, 1  ;;  %s176_s27 = scalar_lea.sflag (!%p734_p5), [#allocation4], %s750_s25 }
  0x33   : > { %s179_s15 = scalar_lea.vmem (!%p734_p5), [#allocation3], %s404_s26 }
  0x36   : > { %588 = dma.done.wait (%p689_p8), %s176_s27, 32  }
  0x37   : > { %590 = vsyncadd (%p689_p8), %s176_s27, 4294967264  ;;  %s185_s5 = scalar_lea.sflag [#allocation7], %s750_s25  ;;  %s188_s16 = scalar_lea.vmem [#allocation6], %s404_s26 }
  0x38   : > { %592 = dma.done.wait (%p689_p8), %s185_s5, 32  }
  0x39   : > { %594 = vsyncadd (%p689_p8), %s185_s5, 4294967264  ;;  %v625_v0 = vmov 0.0   ;;  %v219_v1 = vld [vmem:[%s179_s15] sm:$0x3]  ;;  %v220_v2 = vld [vmem:[%s188_s16] sm:$0x3]  ;;  %v247_v15 = vlaneseq }
  0x3a   : > { %218 = vst [vmem:[#allocation2] sm:$0x1] %v625_v0  ;;  %vm226_vm0 = vcmask 1041408   ;;  %v221_v3 = vadd.f32 %v220_v2, %v219_v1  ;;  %s764_s18 = scalar_lea.vmem [#allocation8], %s404_s26  ;;  %vm240_vm1 = vcmask 1040384   ;;  %s408_s21 = sshll.u32 %s613_s12, 5 }
  0x3b   : > { %v248_v16 = vshrl.u32 %v247_v15, 7  ;;  %s290_s19 = sshll.u32 %s764_s18, 4  ;;  %s288_s29 = scalar_lea.hbm %s813_s2, %s408_s21  ;;  %s291_s19 = int_to_ptr.vmem [resolvable:$true] %s290_s19 }
  0x3c   : > { %v227_v4 = vsel %vm226_vm0, %v221_v3, 0.0  ;;  %224 = vst [vmem:[%s764_s18] sm:$0x3] %v221_v3  ;;  %s277_s3 = scalar_lea.sflag [#allocation5], %s750_s25  ;;  %s537_s7 = scalar_lea.vmem %s291_s19, 32 }
  0x3d   : > { %v228_v5 = vrot.slane %v227_v4, 4  ;;  %v249_v17 = vsub.s32 0, %v248_v16  ;;  %p538_p8 = scmp.ne.s32.totalorder %s291_s19, %s537_s7  ;;  %s626_s8 = smov [#allocation8]  }
  0x3e   : > { %s541_s30 = sshll.u32 %s626_s8, 4  ;;  %s542_s30 = int_to_ptr.vmem [resolvable:$false] %s541_s30 }
  0x3f   : > { %v229_v6 = vadd.f32 %v228_v5, %v227_v4  ;;  %p539_p0 = pnand %p538_p8, %p693_p9  ;;  %s543_s4 = scalar_lea.vmem %s542_s30, 64 }
  0x40   : > { %p544_p13 = scmp.lt.s32.totalorder %s291_s19, %s542_s30  ;;  %p545_p5 = scmp.lt.s32.totalorder %s543_s4, %s537_s7 }
  0x41   : > { %v230_v7 = vrot.slane %v229_v6, 2  ;;  %v225_v10 = vld [vmem:[#allocation2] sm:$0x1]  ;;  %p540_p3 = pneg %p539_p0 }
  0x42   : > { %p546_p12 = por %p545_p5, %p544_p13 }
  0x43   : > { %v231_v8 = vadd.f32 %v230_v7, %v229_v6  ;;  %v246_v20 = vld [vmem:[%s764_s18] sm:$0x3] }
  0x44   : > { %p547_p6 = pnand %p546_p12, %p540_p3 }
  0x45   : > { %v232_v9 = vrot.slane %v231_v8, 1 }
  0x47   : > { %v233_v11 = vadd.f32 %v232_v9, %v231_v8 }
  0x49   : > { %v234_v12 = vadd.f32 %v233_v11, %v225_v10 }
  0x4b   : > { %235 = vst [vmem:[#allocation2] sm:$0x1] %v234_v12 }
  0x52   : > { %v239_v13 = vld [vmem:[#allocation2] sm:$0x1] }
  0x53   : > { %v241_v14 = vsel %vm240_vm1, %v239_v13, 0.0 }
  0x54   : > { %242 = vadd.xlane.f32.xlu0 %v241_v14 }
  0xdd   : > { %v243_v18 = vpop.xlane.xlu0 %242 }
  0xde   : > { %v245_v19 = vmul.f32 0.00390625, %v243_v18 }
  0xe0   : > { %v250_v21 = vrot.slane %v245_v19, %v249_v17  ;;  %v263_v31 = vmul.f32 0.0, %v245_v19 }
  0xe2   : > { %v251_v22 = vsub.f32 %v246_v20, %v250_v21  ;;  %v264_v32 = vmul.f32 %v263_v31, %v245_v19 }
  0xe4   : > { %v252_v23 = vmul.f32 %v251_v22, %v251_v22 }
  0xe6   : > { %v253_v24 = vsel %vm226_vm0, %v252_v23, 0.0 }
  0xe7   : > { %v254_v25 = vrot.slane %v253_v24, 4 }
  0xe9   : > { %v255_v26 = vadd.f32 %v254_v25, %v253_v24 }
  0xeb   : > { %v256_v27 = vrot.slane %v255_v26, 2 }
  0xed   : > { %v257_v28 = vadd.f32 %v256_v27, %v255_v26 }
  0xef   : > { %v258_v29 = vrot.slane %v257_v28, 1 }
  0xf1   : > { %v259_v30 = vadd.f32 %v258_v29, %v257_v28 }
  0xf3   : > { %261 = vadd.xlane.f32.xlu0 %v259_v30 }
 0x17c   : > { %v262_v33 = vpop.xlane.xlu0 %261 }
 0x17d   : > { %v265_v34 = vsub.f32 %v262_v33, %v264_v32 }
 0x17f   : > { %v266_v35 = vmul.f32 0.00390625, %v265_v34 }
 0x181   : > { %v267_v36 = vmax.f32 %v266_v35, 0.0 }
 0x183   : > { %v268_v37 = vadd.f32 1e-05, %v267_v36 }
 0x185   : > { %479 = vrsqrt.f32 %v268_v37 }
 0x192   : > { %v480_v38 = vpop.eup %479 }
 0x193   : > { %v273_v39 = vrot.slane %v480_v38, %v249_v17 }
 0x195   : > { %v274_v40 = vmul.f32 %v273_v39, %v251_v22 }
 0x197   : > { %275 = vst [vmem:[%s764_s18] sm:$0x3] %v274_v40 }
 0x198   : > { %550 = shalt.err (!%p547_p6)
}
 0x199   : > { %s551_s12 = scalar_lea.hbm %s288_s29, 32  ;;  %s555_s26 = scalar_lea.hbm %s813_s2, 64 }
 0x19a   : > { %p552_p7 = scmp.ne.s32.totalorder %s288_s29, %s551_s12  ;;  %p556_p4 = scmp.lt.s32.totalorder %s288_s29, %s813_s2 }
 0x19b   : > { %p557_p10 = scmp.lt.s32.totalorder %s555_s26, %s551_s12 }
 0x19c   : > { %p553_p1 = pnand %p552_p7, %p693_p9 }
 0x19d   : > { %p558_p8 = por %p557_p10, %p556_p4 }
 0x19e   : > { %p554_p2 = pneg %p553_p1 }
 0x1a0   : > { %p559_p0 = pnand %p558_p8, %p554_p2 }
 0x1a2   : > { %562 = shalt.err (!%p559_p0)
}
 0x1a3   : > { %415 = dma.vmem_to_hbm [thread:$0]  (%p693_p9), %s291_s19, 32, %s288_s29, %s277_s3  }
 0x1a4 PF: > { %s302_s5 = sand.u32 1, %s601_s9   ;;  %p820_p3 = scmp.ge.s32.totalorder %s621_s14, 2 }
 0x1a5   : > { %s303_s16 = scalar_lea.sflag [#allocation5], %s302_s5 }
 0x1a6   : > { %p425_p13 = pnand %p820_p3, %p700_p11 }
 0x1a8   : > { %p426_p5 = pneg %p425_p13 }
 0x1aa   : > { %596 = dma.done.wait (%p426_p5), %s303_s16, 32  }
 0x1ab   : > { %598 = vsyncadd (%p426_p5), %s303_s16, 4294967264  ;;  %s21_s14 = sadd.s32 1, %s621_s14   ;;  %s821_s9 = smov %s605_s10 }
 0x1ac   : > { %p18_p12 = scmp.ge.s32.totalorder %s21_s14, 4   ;;  %s822_s10 = smov %s609_s11 }
 0x1ad   : > { %s823_s11 = smov %s698_s23  ;;  %s824_s12 = smov %s617_s13 }
 0x1ae   : > { %s825_s13 = smov %s827_s17  ;;  %20 = sbr.rel (!%p18_p12) target bundleno = 8 (0x8), region = 95 }
 0x1b3   :  { %308 = vsyncpa [#allocation4], 1 }
 0x1b4   :  { %310 = vsyncpa [#allocation4 + $0x1], 1 }
 0x1b5   :  { %311 = vsyncpa [#allocation7], 1 }
 0x1b6   :  { %313 = vsyncpa [#allocation7 + $0x1], 1 }
 0x1b7   :  { %314 = vsyncpa [#allocation5], 1 }
 0x1b8   :  { %316 = vsyncpa [#allocation5 + $0x1], 1 }

</bundles_post_ra>
